<compile_context>
chip_gen: v7x
topology: tpu7x:2x2x1
jax: 0.10.0
libtpu: 0.0.40
codegen_flags: <defaults>
</compile_context>

<pallas_src>
import jax
import jax.numpy as jnp
from jax.experimental import pallas as pl
from jax.experimental.pallas import tpu as pltpu


def _lambda_relu_kernel(x_ref, o_ref):
    # f(x) = ReLU(x), computed on the VPU over the current VMEM tile.
    o_ref[...] = jnp.maximum(x_ref[...], 0)


_LANE_CHOICES = (1024, 512, 256, 128)
_TARGET_BLOCK_BYTES = 2 * 1024 * 1024  # ~2 MiB/block; x2 (in+out) x2 (dbl buffer) = 8 MiB


def _sublane_multiple(dtype):
    itemsize = jnp.dtype(dtype).itemsize
    return {4: 8, 2: 16, 1: 32}.get(itemsize, 8)


def _choose_block_rows(rows, lane, itemsize, sub):
    if rows <= sub:
        return rows                                      # full-extent block (always legal)
    cap = max(sub, _TARGET_BLOCK_BYTES // (lane * itemsize))
    if rows <= cap and rows % sub == 0:
        return rows                                      # whole array in a single block
    return min(rows, (cap // sub) * sub)                 # multiple of sub; ragged tail masked


def _relu_2d(x2d):
    rows, lane = x2d.shape
    dtype = x2d.dtype
    sub = _sublane_multiple(dtype)
    block_rows = _choose_block_rows(rows, lane, jnp.dtype(dtype).itemsize, sub)
    grid = (pl.cdiv(rows, block_rows),)
    return pl.pallas_call(
        _lambda_relu_kernel,
        out_shape=jax.ShapeDtypeStruct((rows, lane), dtype),
        grid_spec=pltpu.PrefetchScalarGridSpec(
            num_scalar_prefetch=0,
            grid=grid,
            in_specs=[pl.BlockSpec((block_rows, lane), lambda i: (i, 0))],
            out_specs=pl.BlockSpec((block_rows, lane), lambda i: (i, 0)),
        ),
        compiler_params=pltpu.CompilerParams(
            dimension_semantics=("parallel",),
        ),
    )(x2d)


def lambda_forward(x):
    """Apply Lambda(f) with f = ReLU via a Pallas TPU kernel.

    Elementwise, so shape and dtype are preserved (works for any rank, e.g. NCHW).
    """
    orig_shape = x.shape
    n = x.size
    if n == 0:
        return x

    # Pick the widest lane dimension (large multiple of 128) that divides the
    # flat element count, so the reshape is pure layout plumbing (no pad copy)
    # and the kernel streams lane-dense blocks.
    lane = next((c for c in _LANE_CHOICES if n % c == 0), None)

    if lane is not None:
        x2d = jnp.reshape(x, (n // lane, lane))
        out2d = _relu_2d(x2d)
        return jnp.reshape(out2d, orig_shape)

    # Ragged fallback (element count not a multiple of 128): pad the flat view
    # to a lane-dense width, run the same kernel, slice the tail back off.
    # TODO(synk): handle the ragged tail in-kernel (masked store on the final
    # partial lane block) to avoid this extra pad/slice HBM round trip.
    lane = 512
    pad = (-n) % lane
    x_flat = jnp.pad(jnp.reshape(x, (-1,)), (0, pad))
    out2d = _relu_2d(jnp.reshape(x_flat, (-1, lane)))
    return jnp.reshape(jnp.reshape(out2d, (-1,))[:n], orig_shape)


if __name__ == "__main__":
    key = jax.random.PRNGKey(0)
    # Small NCHW input consistent with a conv-style pipeline.
    x = jax.random.normal(key, (2, 4, 16, 16), dtype=jnp.float32)

    y = jax.block_until_ready(lambda_forward(x))
    y_ref = jnp.maximum(x, 0.0)
    assert y.shape == x.shape and y.dtype == x.dtype
    assert jnp.allclose(y, y_ref), "mismatch vs reference (f32 NCHW)"

    # Second small shape whose flat size is not a multiple of 1024 (exercises
    # the 512-wide lane path); still no host-side padding required.
    x2 = jax.random.normal(jax.random.PRNGKey(0), (2, 4, 16, 20), dtype=jnp.float32)
    y2 = jax.block_until_ready(lambda_forward(x2))
    assert jnp.allclose(y2, jnp.maximum(x2, 0.0)), "mismatch vs reference (512-lane path)"

    print("KERNEL_OK")
</pallas_src>

<mosaic_0001>
module attributes {stable_mosaic.version = 11 : i64} {
  func.func @_lambda_relu_kernel(%arg0: i32, %arg1: memref<2x1024xf32, #tpu.memory_space<vmem>>, %arg2: memref<2x1024xf32, #tpu.memory_space<vmem>>) attributes {dimension_semantics = [#tpu.dimension_semantics<parallel>], iteration_bounds = array<i64: 1>, scalar_prefetch = 0 : i64, scratch_operands = 0 : i64, tpu.core_type = #tpu.core_type<tc>, window_params = [{transform_indices = @transform_0, window_bounds = array<i64: 2, 1024>}, {transform_indices = @transform_1, window_bounds = array<i64: 2, 1024>}]} {
    %c0 = arith.constant 0 : index
    %c0_0 = arith.constant 0 : index
    %0 = vector.load %arg1[%c0, %c0_0] : memref<2x1024xf32, #tpu.memory_space<vmem>>, vector<2x1024xf32>
    %cst = arith.constant 0.000000e+00 : f32
    %1 = vector.broadcast %cst : f32 to vector<2x1024xf32>
    %2 = arith.maximumf %0, %1 : vector<2x1024xf32>
    %c0_1 = arith.constant 0 : index
    %c0_2 = arith.constant 0 : index
    %3 = vector.load %arg2[%c0_1, %c0_2] : memref<2x1024xf32, #tpu.memory_space<vmem>>, vector<2x1024xf32>
    tpu.vector_store %arg2[%c0_1, %c0_2], %2 {strides = array<i32>} : memref<2x1024xf32, #tpu.memory_space<vmem>>, vector<2x1024xf32>,
    return
  }
  func.func @transform_0(%arg0: i32) -> (i32, i32) {
    %c0_i32 = arith.constant 0 : i32
    %c0_i32_0 = arith.constant 0 : i32
    return %arg0, %c0_i32 : i32, i32
  }
  func.func @transform_1(%arg0: i32) -> (i32, i32) {
    %c0_i32 = arith.constant 0 : i32
    %c0_i32_0 = arith.constant 0 : i32
    return %arg0, %c0_i32 : i32, i32
  }
}

</mosaic_0001>

<bundles_post_ra>
// kernel: tpu_custom_call.1
= control target key start
LH: loop header
LB: loop body
LE: loop exit
PB: predicated region body
PF: predicated region fallthrough
CT: control target
= control target key end

     0   :  { %6 = vsyncpa [#allocation3], 0  ;;  %s128_s0 = inlined_call_operand.hbm [shape: f32[2,1024], index: 0, kind: input, shape index: {}]   ;;  %s129_s1 = inlined_call_operand.hbm [shape: f32[2,1024], index: 1, kind: output, shape index: {}]  }
   0x1   :  { %7 = vsyncpa [#allocation4], 0  ;;  %s92_s6 = smov [#allocation2]   ;;  %s44_s10 = scalar_lea.hbm %s128_s0, 256 }
   0x2   :  { %s14_s7 = sshll.u32 %s92_s6, 4  ;;  %p45_p0 = scmp.ne.s32.totalorder %s128_s0, %s44_s10  ;;  %s15_s7 = int_to_ptr.vmem [resolvable:$true] %s14_s7 }
   0x3   :  { %p48_p1 = scmp.lt.u32.totalorder %s44_s10, %s128_s0 }
   0x5   :  { %p50_p2 = pnand %p48_p1, %p45_p0 }
   0x7   :  { %53 = shalt.err (!%p50_p2)
}
   0x8   :  { %s54_s15 = scalar_lea.vmem %s15_s7, 256  ;;  %p59_p4 = scmp.lt.s32.totalorder %s15_s7, %s15_s7 }
   0x9   :  { %p55_p3 = scmp.ne.s32.totalorder %s15_s7, %s54_s15  ;;  %p60_p5 = scmp.lt.s32.totalorder %s54_s15, %s54_s15 }
   0xb   :  { %p61_p6 = por %p60_p5, %p59_p4 }
   0xd   :  { %p62_p7 = pnand %p61_p6, %p55_p3 }
   0xf   :  { %65 = shalt.err (!%p62_p7)
}
  0x10   :  { %17 = dma.hbm_to_vmem [thread:$0]  %s128_s0, 256, %s15_s7, [#allocation3]  }
  0x11   :  { %88 = dma.done.wait [#allocation3], 256  }
  0x12   :  { %89 = vsyncadd [#allocation3], 4294967040  ;;  %s93_s18 = smov [#allocation5]   ;;  %v21_v0 = vld [vmem:[#allocation2] sm:$0xff]  ;;  %v22_v1 = vld [vmem:[#allocation2 + $0x8] sm:$0xff] }
  0x13   :  { %s33_s19 = sshll.u32 %s93_s18, 4  ;;  %v23_v2 = vmax.f32 %v21_v0, 0.0  ;;  %v24_v3 = vmax.f32 %v22_v1, 0.0  ;;  %s34_s19 = int_to_ptr.vmem [resolvable:$true] %s33_s19 }
  0x14   :  { %s66_s20 = scalar_lea.vmem %s34_s19, 256  ;;  %p71_p9 = scmp.lt.s32.totalorder %s34_s19, %s34_s19 }
  0x15   :  { %25 = vst [vmem:[#allocation5] sm:$0xff] %v23_v2  ;;  %26 = vst [vmem:[#allocation5 + $0x8] sm:$0xff] %v24_v3  ;;  %p67_p8 = scmp.ne.s32.totalorder %s34_s19, %s66_s20  ;;  %p72_p10 = scmp.lt.s32.totalorder %s66_s20, %s66_s20 }
  0x17   :  { %p73_p11 = por %p72_p10, %p71_p9 }
  0x19   :  { %p74_p12 = pnand %p73_p11, %p67_p8 }
  0x1b   :  { %77 = shalt.err (!%p74_p12)
}
  0x1c   :  { %s78_s22 = scalar_lea.hbm %s129_s1, 256 }
  0x1d   :  { %p79_p13 = scmp.ne.s32.totalorder %s129_s1, %s78_s22  ;;  %p82_p0 = scmp.lt.u32.totalorder %s78_s22, %s129_s1 }
  0x1f   :  { %p84_p1 = pnand %p82_p0, %p79_p13 }
  0x21   :  { %87 = shalt.err (!%p84_p1)
}
  0x22   :  { %36 = dma.vmem_to_hbm [thread:$0]  %s34_s19, 256, %s129_s1, [#allocation4]  }
  0x23   :  { %90 = dma.done.wait [#allocation4], 256  }
  0x24   :  { %91 = vsyncadd [#allocation4], 4294967040 }
  0x25   :  { %40 = vsyncpa [#allocation3], 1 }
  0x26   :  { %41 = vsyncpa [#allocation4], 1 }

</bundles_post_ra>
